<compile_context>
chip_gen: v6e
topology: v6e:2x2x1
jax: 0.10.0
libtpu: 0.0.40
codegen_flags: <defaults>
</compile_context>

<pallas_src>
import jax
import jax.numpy as jnp
from jax.experimental import pallas as pl
from jax.experimental.pallas import tpu as pltpu

LINEAR_SCALE = 5000.0


def _pos_enc_kernel(nl_ref, exps_ref, out_ref):
    # nl_ref  : (TB, 1)        f32
    # exps_ref: (1, half)      f32   (constant; LINEAR_SCALE already folded in)
    # out_ref : (TB, 2, half)  f32
    args = nl_ref[...] * exps_ref[...]      # (TB, half): single broadcast mul
    out_ref[:, 0, :] = jnp.sin(args)        # lane-dense store at offset 0
    out_ref[:, 1, :] = jnp.cos(args)        # lane-dense store at offset 0


def _choose_batch_tile(half: int, *, max_rows: int = 2048,
                       target_bytes: int = 4 << 20) -> int:
    """Batch rows per grid step, sized from a per-stage VMEM byte budget.

    Per grid step (f32), conservatively assuming (8, 128) tiling:
      * output block (tb, 2, half): (2, half) slab pads to (8, round_up(half,128))
        -> 8 * lane_w * 4 bytes per batch row.
      * noise-level block (tb, 1): pads to (tb, 128) -> 512 bytes per row.
    Double buffering doubles this; a 4 MiB target keeps the pipeline well
    inside v5e's 16 MiB scoped-VMEM default while tiles stay large enough
    (>= ~100 rows even at n_channels = 2048) to amortize ~0.35 us/step.
    """
    lane_w = ((half + 127) // 128) * 128
    bytes_per_row = 8 * lane_w * 4 + 128 * 4
    tb = (target_bytes // bytes_per_row) // 8 * 8
    return int(max(8, min(max_rows, tb)))


def positional_encoding(noise_level: jax.Array, n_channels: int) -> jax.Array:
    """Pallas TPU implementation of PositionalEncoding.forward."""
    assert n_channels % 2 == 0, "n_channels must be even"

    # Matches the PyTorch squeeze of a trailing singleton dim.
    if noise_level.ndim > 1:
        noise_level = jnp.squeeze(noise_level, axis=-1)
    noise_level = noise_level.astype(jnp.float32)
    b = noise_level.shape[0]
    half = n_channels // 2

    nl2d = noise_level.reshape(b, 1)  # TPU wants >= 2D (batch on sublanes)

    # Hoisted constant exponent table with the linear scale folded in;
    # computed once here (constant-folded) and held resident across grid steps.
    exps = (jnp.float32(LINEAR_SCALE)
            * jnp.float32(1e-4)
            ** (jnp.arange(half, dtype=jnp.float32) / jnp.float32(half))
            ).reshape(1, half)

    # --- batch tiling --------------------------------------------------------
    if b <= 32:
        # Tiny batch: one full block; the call is launch-overhead dominated.
        tb = b
    else:
        tb_budget = _choose_batch_tile(half)
        steps = max(2, pl.cdiv(b, tb_budget))   # >= 2 steps for v7x dual-TC
        steps = steps + (steps % 2)             # even step count -> balanced split
        tb = max(8, ((pl.cdiv(b, steps) + 7) // 8) * 8)
    grid = (pl.cdiv(b, tb),)

    out3 = pl.pallas_call(
        _pos_enc_kernel,
        out_shape=jax.ShapeDtypeStruct((b, 2, half), jnp.float32),
        grid=grid,
        in_specs=[
            pl.BlockSpec((tb, 1), lambda i: (i, 0)),
            pl.BlockSpec((1, half), lambda i: (0, 0)),
        ],
        out_specs=pl.BlockSpec((tb, 2, half), lambda i: (i, 0, 0)),
        compiler_params=pltpu.CompilerParams(
            dimension_semantics=("parallel",),   # shard batch tiles across TCs
            vmem_limit_bytes=32 * 1024 * 1024,   # explicit headroom, all gens
        ),
    )(nl2d, exps)

    # Row-major merge of the (2, half) minor dims -> (B, n_channels): free.
    return out3.reshape(b, n_channels)


def _reference(noise_level: jax.Array, n_channels: int) -> jax.Array:
    if noise_level.ndim > 1:
        noise_level = jnp.squeeze(noise_level, axis=-1)
    half = n_channels // 2
    exps = jnp.float32(1e-4) ** (jnp.arange(half, dtype=jnp.float32) / half)
    args = LINEAR_SCALE * noise_level.astype(jnp.float32)[:, None] * exps[None, :]
    return jnp.concatenate([jnp.sin(args), jnp.cos(args)], axis=-1)


if __name__ == "__main__":
    key = jax.random.PRNGKey(0)
    B = 8
    N_CHANNELS = 32

    # noise level in [0, 1), shape (B, 1) to exercise the squeeze path.
    noise_level = jax.random.uniform(key, (B, 1), dtype=jnp.float32)

    out = jax.block_until_ready(positional_encoding(noise_level, N_CHANNELS))
    ref = _reference(noise_level, N_CHANNELS)

    assert out.shape == (B, N_CHANNELS), out.shape
    # Arguments reach ~5000.  f32 ulp there is ~4.9e-4; folding the 5000x scale
    # into the exponent table changes the rounding order vs. the reference
    # ((5000*exps)*nl instead of (5000*nl)*exps), bounding the combined
    # argument rounding difference by ~4 ulp(arg) ~ 1.2e-3, and sin/cos
    # propagate argument error 1:1 (plus a few ulps of range-reduction
    # difference between Mosaic and XLA).  2e-3 absolute is the honest f32
    # bound and still catches any structural bug (wrong exps, order, scale).
    assert jnp.allclose(out, ref, atol=2e-3, rtol=1e-5), (
        float(jnp.max(jnp.abs(out - ref)))
    )
    print("KERNEL_OK")
</pallas_src>

<mosaic_0001>
module attributes {stable_mosaic.version = 11 : i64} {
  func.func @_pos_enc_kernel(%arg0: i32, %arg1: memref<8x1xf32, #tpu.memory_space<vmem>>, %arg2: memref<1x16xf32, #tpu.memory_space<vmem>>, %arg3: memref<8x2x16xf32, #tpu.memory_space<vmem>>) attributes {dimension_semantics = [#tpu.dimension_semantics<parallel>], iteration_bounds = array<i64: 1>, scalar_prefetch = 0 : i64, scratch_operands = 0 : i64, tpu.core_type = #tpu.core_type<tc>, window_params = [{transform_indices = @transform_0, window_bounds = array<i64: 8, 1>}, {pipeline_mode = #tpu.pipeline_mode<synchronous>, transform_indices = @transform_1, window_bounds = array<i64: 1, 16>}, {transform_indices = @transform_2, window_bounds = array<i64: 8, 2, 16>}]} {
    %c0 = arith.constant 0 : index
    %c0_0 = arith.constant 0 : index
    %0 = vector.load %arg1[%c0, %c0_0] : memref<8x1xf32, #tpu.memory_space<vmem>>, vector<8x1xf32>
    %c0_1 = arith.constant 0 : index
    %c0_2 = arith.constant 0 : index
    %1 = vector.load %arg2[%c0_1, %c0_2] : memref<1x16xf32, #tpu.memory_space<vmem>>, vector<1x16xf32>
    %2 = vector.broadcast %0 : vector<8x1xf32> to vector<8x16xf32>
    %3 = vector.broadcast %1 : vector<1x16xf32> to vector<8x16xf32>
    %4 = arith.mulf %2, %3 : vector<8x16xf32>
    %5 = math.sin %4 : vector<8x16xf32>
    %c0_3 = arith.constant 0 : index
    %c0_4 = arith.constant 0 : index
    %c0_5 = arith.constant 0 : index
    %6 = vector.load %arg3[%c0_3, %c0_4, %c0_5] : memref<8x2x16xf32, #tpu.memory_space<vmem>>, vector<8x1x16xf32>
    %7 = vector.shape_cast %6 : vector<8x1x16xf32> to vector<8x16xf32>
    %8 = vector.shape_cast %5 : vector<8x16xf32> to vector<8x1x16xf32>
    tpu.vector_store %arg3[%c0_3, %c0_4, %c0_5], %8 {strides = array<i32>} : memref<8x2x16xf32, #tpu.memory_space<vmem>>, vector<8x1x16xf32>,
    %9 = math.cos %4 : vector<8x16xf32>
    %c0_6 = arith.constant 0 : index
    %c1 = arith.constant 1 : index
    %c0_7 = arith.constant 0 : index
    %10 = vector.load %arg3[%c0_6, %c1, %c0_7] : memref<8x2x16xf32, #tpu.memory_space<vmem>>, vector<8x1x16xf32>
    %11 = vector.shape_cast %10 : vector<8x1x16xf32> to vector<8x16xf32>
    %12 = vector.shape_cast %9 : vector<8x16xf32> to vector<8x1x16xf32>
    tpu.vector_store %arg3[%c0_6, %c1, %c0_7], %12 {strides = array<i32>} : memref<8x2x16xf32, #tpu.memory_space<vmem>>, vector<8x1x16xf32>,
    return
  }
  func.func @transform_0(%arg0: i32) -> (i32, i32) {
    %c0_i32 = arith.constant 0 : i32
    %c0_i32_0 = arith.constant 0 : i32
    return %arg0, %c0_i32 : i32, i32
  }
  func.func @transform_1(%arg0: i32) -> (i32, i32) {
    %c0_i32 = arith.constant 0 : i32
    %c0_i32_0 = arith.constant 0 : i32
    %c0_i32_1 = arith.constant 0 : i32
    return %c0_i32, %c0_i32_0 : i32, i32
  }
  func.func @transform_2(%arg0: i32) -> (i32, i32, i32) {
    %c0_i32 = arith.constant 0 : i32
    %c0_i32_0 = arith.constant 0 : i32
    %c0_i32_1 = arith.constant 0 : i32
    return %arg0, %c0_i32, %c0_i32_0 : i32, i32, i32
  }
}

</mosaic_0001>

<bundles_post_ra>
// kernel: tpu_custom_call.1
= control target key start
LH: loop header
LB: loop body
LE: loop exit
PB: predicated region body
PF: predicated region fallthrough
CT: control target
= control target key end

     0   :  { %v433_v1 = vmov 0   ;;  %s505_s0 = inlined_call_operand.vmem [shape: f32[8,1], index: 0, kind: input, shape index: {}]   ;;  %s506_s1 = inlined_call_operand.vmem [shape: f32[1,16], index: 1, kind: input, shape index: {}]   ;;  %s507_s2 = inlined_call_operand.hbm [shape: f32[8,2,16], index: 2, kind: output, shape index: {}]  }
   0x1   :  { %v12_v0 = vld [vmem:[%s505_s0] sm:$0xff]  ;;  %406 = vset.pattern.permute.xlu0 %v433_v1 }
   0x2   :  { %16 = vperm.xlu0 %406, %v12_v0  }
   0x3   :  { %7 = vsyncpa [#allocation3], 0  ;;  %v382_v2 = vld [vmem:[%s506_s1] ss:$0 sm:$0xff]  ;;  %v434_v15 = vmov 683565275  }
   0x4   :  { %v435_v17 = vmov 2475754826   ;;  %v436_v20 = vmov 2131351028   ;;  %v437_v23 = vmov 2102212464  }
   0x5   :  { %v438_v26 = vmov 920167782   ;;  %v439_v29 = vmov 1326507024   ;;  %s441_s0 = smov [#allocation2]  }
   0x6   :  { %s371_s1 = sshll.u32 %s441_s0, 4  ;;  %s372_s1 = int_to_ptr.vmem [resolvable:$true] %s371_s1 }
   0x7   :  { %s411_s13 = scalar_lea.vmem %s372_s1, 256  ;;  %p416_p1 = scmp.lt.s32.totalorder %s372_s1, %s372_s1 }
   0x8   :  { %p412_p0 = scmp.ne.s32.totalorder %s372_s1, %s411_s13  ;;  %p417_p2 = scmp.lt.s32.totalorder %s411_s13, %s411_s13 }
   0xa   :  { %p418_p3 = por %p417_p2, %p416_p1 }
   0xc   :  { %p419_p4 = pnand %p418_p3, %p412_p0 }
  0x7d   :  { %v17_v3 = vpop.permute.xlu0 %16 }
  0x7e   :  { %v465_v4 = vmul.f32 %v382_v2, %v17_v3 }
  0x80   :  { %v29_v5 = vand.u32 2139095040, %v465_v4  ;;  %v26_v9 = vand.u32 2147483647, %v465_v4  ;;  %vm28_vm7 = vcmp.lt.s32.totalorder %v465_v4, 0  ;;  %vm118_vm15 = vweird.f32 %v465_v4 }
  0x82   :  { %v30_v6 = vshrl.u32 %v29_v5, 23  ;;  %v33_v12 = vand.u32 8388607, %v26_v9  ;;  %vm27_vm8 = vcmp.le.f32.partialorder %v26_v9, 0.7853982 }
  0x84   :  { %v383_v7 = vadd.s32 4294967169, %v30_v6  ;;  %v34_v31 = vor.u32 8388608, %v33_v12 }
  0x86   :  { %v36_v8 = vadd.s32 1, %v383_v7  ;;  %v74_v45 = vshll.u32 %v34_v31, 8 }
  0x88   :  { %vm37_vm0 = vcmp.gt.s32.totalorder %v36_v8, 0 }
  0x89   :  { %v38_v10 = vsel %vm37_vm0, %v36_v8, 0  ;;  %vm188_vm0 = vcmask 122880  }
  0x8a   :  { %v40_v11 = vand.u32 31, %v38_v10  ;;  %v39_v14 = vshrl.u32 %v38_v10, 5 }
  0x8c   :  { %v41_v13 = vsub.s32 32, %v40_v11  ;;  %v43_v16 = vshll.u32 %v434_v15, %v40_v11  ;;  %v46_v18 = vshll.u32 %v435_v17, %v40_v11  ;;  %v49_v22 = vshll.u32 %v436_v20, %v40_v11 }
  0x8d   :  { %v52_v25 = vshll.u32 %v437_v23, %v40_v11  ;;  %v55_v28 = vshll.u32 %v438_v26, %v40_v11  ;;  %vm58_vm1 = vcmp.lt.s32.totalorder %v39_v14, 1  ;;  %vm61_vm2 = vcmp.lt.s32.totalorder %v39_v14, 4 }
  0x8e   :  { %v44_v19 = vshrl.u32 %v435_v17, %v41_v13  ;;  %v47_v21 = vshrl.u32 %v436_v20, %v41_v13  ;;  %v50_v24 = vshrl.u32 %v437_v23, %v41_v13  ;;  %v53_v27 = vshrl.u32 %v438_v26, %v41_v13 }
  0x8f   :  { %v56_v30 = vshrl.u32 %v439_v29, %v41_v13  ;;  %v42_v40 = vshrl.u32 %v434_v15, %v41_v13  ;;  %vm60_vm3 = vcmp.lt.s32.totalorder %v39_v14, 3  ;;  %vm59_vm4 = vcmp.lt.s32.totalorder %v39_v14, 2 }
  0x90   :  { %v45_v32 = vor.u32 %v44_v19, %v43_v16  ;;  %v48_v33 = vor.u32 %v47_v21, %v46_v18  ;;  %v51_v34 = vor.u32 %v50_v24, %v49_v22  ;;  %v54_v35 = vor.u32 %v53_v27, %v52_v25 }
  0x91   :  { %v57_v36 = vor.u32 %v56_v30, %v55_v28  ;;  %v440_v24 = vmov 1966171168   ;;  %v135_v26 = vlaneseq }
  0x92   :  { %v63_v37 = vsel %vm61_vm2, %v51_v34, 2102212464  ;;  %v66_v38 = vsel %vm58_vm1, %v45_v32, %v48_v33  ;;  %v70_v39 = vsel %vm58_vm1, %v48_v33, %v51_v34  ;;  %v67_v41 = vsel %vm61_vm2, %v54_v35, 920167782 }
  0x93   :  { %v71_v42 = vsel %vm61_vm2, %v57_v36, 1326507024  ;;  %v68_v43 = vsel %vm60_vm3, %v51_v34, %v67_v41  ;;  %v62_v46 = vsel %vm58_vm1, %v42_v40, %v45_v32  ;;  %v64_v47 = vsel %vm60_vm3, %v48_v33, %v63_v37 }
  0x94   :  { %v72_v44 = vsel %vm60_vm3, %v54_v35, %v71_v42  ;;  %v69_v48 = vsel %vm59_vm4, %v66_v38, %v68_v43  ;;  %v65_v54 = vsel %vm59_vm4, %v62_v46, %v64_v47  ;;  %v133_v25 = vunpack.c.l.s4 %v440_v24 }
  0x95   :  { %v73_v49 = vsel %vm59_vm4, %v70_v39, %v72_v44  ;;  %v474_v52 = vmul.u32.u64.low %v74_v45, %v69_v48  ;;  %v475_v53 = vmul.u32.u64.high %v74_v45, %v69_v48, %v474_v52  ;;  %v81_v56 = vmul.u32 %v74_v45, %v65_v54 }
  0x96   :  { %v471_v50 = vmul.u32.u64.low %v74_v45, %v73_v49  ;;  %v472_v51 = vmul.u32.u64.high %v74_v45, %v73_v49, %v471_v50  ;;  %v134_v28 = vunpack.c.0.s8 %v133_v25  ;;  %v136_v29 = vshrl.u32 %v135_v26, 7 }
  0x97   :  { %v84_v55 = vadd.s32 1, %v475_v53 }
  0x98   :  { %vm83_vm5 = vc.u32 %v472_v51, %v474_v52  ;;  %v82_v5 = vadd.s32 %v474_v52, %v472_v51  ;;  %v137_v35 = vsub.s32 %v134_v28, %v136_v29 }
  0x99   :  { %v85_v57 = vsel %vm83_vm5, %v84_v55, %v475_v53 }
  0x9a   :  { %v86_v58 = vadd.s32 %v85_v57, %v81_v56 }
  0x9c   :  { %v87_v59 = vadd.s32 536870912, %v86_v58 }
  0x9e   :  { %v88_v60 = vshrl.u32 %v87_v59, 30 }
  0xa0   :  { %v89_v61 = vshll.u32 %v88_v60, 30  ;;  %v112_v19 = vsub.s32 4, %v88_v60 }
  0xa2   :  { %v90_v62 = vsub.s32 %v86_v58, %v89_v61  ;;  %v113_v22 = vsel %vm28_vm7, %v112_v19, %v88_v60 }
  0xa3   :  { %v115_v23 = vsel %vm27_vm8, 0, %v113_v22 }
  0xa4   :  { %v92_v63 = vsub.s32 0, %v90_v62  ;;  %v119_v27 = vadd.s32 3, %v115_v23  ;;  %v290_v31 = vand.u32 3, %v115_v23 }
  0xa6   :  { %v384_v0 = vmin.u32 %v92_v63, %v90_v62  ;;  %v120_v30 = vand.u32 3, %v119_v27  ;;  %vm295_vm10 = vcmp.eq.s32.totalorder %v290_v31, 2  ;;  %vm292_vm12 = vcmp.eq.s32.totalorder %v290_v31, 0 }
  0xa7   :  { %vm291_vm14 = vcmp.lt.s32.totalorder %v290_v31, 2 }
  0xa8   :  { %v94_v1 = vclz %v384_v0  ;;  %vm125_vm9 = vcmp.eq.s32.totalorder %v120_v30, 2  ;;  %vm122_vm11 = vcmp.eq.s32.totalorder %v120_v30, 0  ;;  %vm121_vm13 = vcmp.lt.s32.totalorder %v120_v30, 2 }
  0xaa   :  { %v385_v2 = vadd.s32 4294967294, %v94_v1 }
  0xac   :  { %vm386_vm6 = vcmp.lt.s32.totalorder %v385_v2, 0 }
  0xad   :  { %v97_v3 = vsel %vm386_vm6, 0, %v385_v2 }
  0xae   :  { %v98_v6 = vsub.s32 32, %v97_v3  ;;  %v102_v7 = vsub.s32 4294967266, %v97_v3  ;;  %v99_v8 = vshll.u32 %v90_v62, %v97_v3 }
  0xb0   :  { %v100_v10 = vshrl.u32 %v82_v5, %v98_v6  ;;  %v103_v11 = vadd.s32 127, %v102_v7 }
  0xb2   :  { %v101_v12 = vor.u32 %v100_v10, %v99_v8  ;;  %v104_v13 = vshll.u32 %v103_v11, 23 }
  0xb4   :  { %v105_v14 = vor.u32 4788187, %v104_v13  ;;  %v108_v16 = vcvt.s32.f32 %v101_v12 }
  0xb6   :  { %v106_v15 = vand.u32 2147483647, %v105_v14 }
  0xb8   :  { %v109_v17 = vmul.f32 %v108_v16, %v106_v15 }
  0xba   :  { %v110_v18 = vxor.u32 2147483648, %v109_v17 }
  0xbc   :  { %v111_v20 = vsel %vm28_vm7, %v110_v18, %v109_v17 }
  0xbd   :  { %v114_v21 = vsel %vm27_vm8, %v465_v4, %v111_v20 }
  0xbe   :  { %407 = vcosq.f32 %v114_v21 }
  0xbf   :  { %409 = vsinq.f32 %v114_v21 }
  0xcb   :  { %v408_v32 = vpop.eup %407 }
  0xcc   :  { %v410_v33 = vpop.eup %409  ;;  %v126_v34 = vxor.u32 2147483648, %v408_v32 }
  0xcd   :  { %v123_v9 = vxor.u32 2147483648, %v410_v33 }
  0xce   :  { %v127_v36 = vsel %vm125_vm9, %v126_v34, %v410_v33  ;;  %v297_v37 = vsel %vm295_vm10, %v126_v34, %v410_v33 }
  0xcf   :  { %v124_v38 = vsel %vm122_vm11, %v408_v32, %v123_v9  ;;  %v294_v39 = vsel %vm292_vm12, %v408_v32, %v123_v9 }
  0xd0   :  { %v128_v40 = vsel %vm121_vm13, %v124_v38, %v127_v36  ;;  %v298_v41 = vsel %vm291_vm14, %v294_v39, %v297_v37 }
  0xd1   :  { %v129_v42 = vsel %vm118_vm15, nan, %v128_v40  ;;  %v299_v43 = vsel %vm118_vm15, nan, %v298_v41 }
  0xd2   :  { %v131_v44 = vcombine.high %v129_v42, %v129_v42  ;;  %v138_v45 = vrot.slane %v129_v42, %v137_v35  ;;  %v301_v46 = vcombine.high %v299_v43, %v299_v43  ;;  %v308_v47 = vrot.slane %v299_v43, %v137_v35 }
  0xd4   :  { %v145_v48 = vrot.slane %v131_v44, %v137_v35  ;;  %v146_v49 = vcombine.high %v138_v45, %v138_v45  ;;  %v154_v50 = vrot.slane %v138_v45, %v137_v35  ;;  %v315_v51 = vrot.slane %v301_v46, %v137_v35 }
  0xd5   :  { %v316_v52 = vcombine.high %v308_v47, %v308_v47  ;;  %v324_v53 = vrot.slane %v308_v47, %v137_v35 }
  0xd6   :  { %v147_v54 = vcombine.high %v145_v48, %v145_v48  ;;  %v161_v55 = vrot.slane %v145_v48, %v137_v35  ;;  %v168_v56 = vrot.slane %v146_v49, %v137_v35  ;;  %v176_v57 = vcombine.high %v154_v50, %v154_v50  ;;  %189 = vst.msk [vmem:[#allocation2] sm:$0x1] %vm188_vm0, %v154_v50 }
  0xd7   :  { %v317_v4 = vcombine.high %v315_v51, %v315_v51  ;;  %v331_v58 = vrot.slane %v315_v51, %v137_v35  ;;  %v338_v59 = vrot.slane %v316_v52, %v137_v35  ;;  %v346_v60 = vcombine.high %v324_v53, %v324_v53  ;;  %358 = vst.msk [vmem:[#allocation2 + $0x1] sm:$0x1] %vm188_vm0, %v324_v53 }
  0xd8   :  { %v175_v61 = vrot.slane %v147_v54, %v137_v35  ;;  %v177_v62 = vcombine.high %v161_v55, %v161_v55  ;;  %v178_v63 = vcombine.high %v168_v56, %v168_v56  ;;  %190 = vst.msk [vmem:[#allocation2 + $0x2] sm:$0x1] %vm188_vm0, %v168_v56  ;;  %191 = vst.msk [vmem:[#allocation2 + $0x4] sm:$0x1] %vm188_vm0, %v176_v57 }
  0xd9   :  { %193 = vst.msk [vmem:[#allocation2 + $0x8] sm:$0x1] %vm188_vm0, %v161_v55  ;;  %v345_v0 = vrot.slane %v317_v4, %v137_v35  ;;  %v347_v1 = vcombine.high %v331_v58, %v331_v58  ;;  %v348_v2 = vcombine.high %v338_v59, %v338_v59  ;;  %359 = vst.msk [vmem:[#allocation2 + $0x3] sm:$0x1] %vm188_vm0, %v338_v59 }
  0xda   :  { %360 = vst.msk [vmem:[#allocation2 + $0x5] sm:$0x1] %vm188_vm0, %v346_v60  ;;  %362 = vst.msk [vmem:[#allocation2 + $0x9] sm:$0x1] %vm188_vm0, %v331_v58  ;;  %v179_v3 = vcombine.high %v175_v61, %v175_v61 }
  0xdb   :  { %192 = vst.msk [vmem:[#allocation2 + $0x6] sm:$0x1] %vm188_vm0, %v178_v63  ;;  %194 = vst.msk [vmem:[#allocation2 + $0xa] sm:$0x1] %vm188_vm0, %v175_v61  ;;  %v349_v5 = vcombine.high %v345_v0, %v345_v0 }
  0xdc   :  { %195 = vst.msk [vmem:[#allocation2 + $0xc] sm:$0x1] %vm188_vm0, %v177_v62  ;;  %361 = vst.msk [vmem:[#allocation2 + $0x7] sm:$0x1] %vm188_vm0, %v348_v2 }
  0xdd   :  { %363 = vst.msk [vmem:[#allocation2 + $0xb] sm:$0x1] %vm188_vm0, %v345_v0  ;;  %364 = vst.msk [vmem:[#allocation2 + $0xd] sm:$0x1] %vm188_vm0, %v347_v1 }
  0xde   :  { %196 = vst.msk [vmem:[#allocation2 + $0xe] sm:$0x1] %vm188_vm0, %v179_v3  ;;  %365 = vst.msk [vmem:[#allocation2 + $0xf] sm:$0x1] %vm188_vm0, %v349_v5 }
  0xdf   :  { %422 = shalt.err (!%p419_p4)
}
  0xe0   :  { %s442_s14 = smov 32   ;;  %s443_s15 = smov 2  }
  0xe1   :  { %377 = dma.vmem_to_hbm [thread:$0]  %s372_s1, 256, %s507_s2, [#allocation3], %s442_s14, %s442_s14, %s443_s15  }
  0xe2   :  { %431 = dma.done.wait [#allocation3], 256  }
  0xe3   :  { %432 = vsyncadd [#allocation3], 4294967040 }
  0xe4   :  { %381 = vsyncpa [#allocation3], 1 }

</bundles_post_ra>
